<compile_context>
chip_gen: v7x
topology: tpu7x:2x2x1
jax: 0.10.0
libtpu: 0.0.40
codegen_flags: <defaults>
</compile_context>

<pallas_src>
import functools

import jax
import jax.numpy as jnp
from jax import lax
from jax.experimental import pallas as pl
from jax.experimental.pallas import tpu as pltpu

_LANE = 128
_CHUNK = 512  # lanes per fused add/max chunk (4 f32 vregs per 8-row group)


def _ta_pool_kernel(x_ref, o_ref, sum_ref, max_ref, *, S, TS, CW, n_chunks,
                    need_mask):
    # x_ref: (TR, TS)   o_ref: (TR, 2) f32   sum_ref/max_ref: (TR, CW) f32
    s = pl.program_id(1)
    ns = pl.num_programs(1)

    @pl.when(s == 0)
    def _():
        sum_ref[...] = jnp.zeros_like(sum_ref)
        max_ref[...] = jnp.full_like(max_ref, -jnp.inf)

    def load_chunk(c):
        if n_chunks == 1:
            return x_ref[...].astype(jnp.float32), 0
        off = pl.multiple_of(c * CW, CW)
        return x_ref[:, pl.ds(off, CW)].astype(jnp.float32), off

    def accumulate(masked):
        def body(c, carry):
            s_acc, m_acc = carry
            chunk, off = load_chunk(c)
            if masked:
                # Only reached on the last spatial tile (and only if S % TS != 0).
                valid = S - s * TS
                lane = lax.broadcasted_iota(jnp.int32, chunk.shape, 1) + off
                keep = lane < valid
                s_acc = s_acc + jnp.where(keep, chunk, 0.0)
                m_acc = jnp.maximum(m_acc, jnp.where(keep, chunk, -jnp.inf))
            else:
                s_acc = s_acc + chunk
                m_acc = jnp.maximum(m_acc, chunk)
            return s_acc, m_acc

        init = (sum_ref[...], max_ref[...])
        if n_chunks == 1:
            final = body(0, init)
        else:
            final = lax.fori_loop(0, n_chunks, body, init,
                                  unroll=True if n_chunks <= 8 else False)
        sum_ref[...] = final[0]
        max_ref[...] = final[1]

    if need_mask:
        @pl.when(s != ns - 1)
        def _():
            accumulate(masked=False)

        @pl.when(s == ns - 1)
        def _():
            accumulate(masked=True)
    else:
        accumulate(masked=False)

    @pl.when(s == ns - 1)
    def _():
        # Deferred cross-lane reduce + mean normalization (once per row tile).
        avg = jnp.sum(sum_ref[...], axis=-1, keepdims=True) * (1.0 / S)  # (TR,1)
        mx = jnp.max(max_ref[...], axis=-1, keepdims=True)               # (TR,1)
        o_ref[...] = jnp.concatenate([avg, mx], axis=-1).astype(o_ref.dtype)


def _pick_row_tile(R, S, itemsize, target_bytes):
    """Rows per tile: multiple of the sublane packing (8 f32/16 bf16/32 int8)."""
    packing = max(1, 4 // max(1, itemsize))
    min_rows = 8 * packing
    if R % min_rows != 0:
        return R  # block == full row dim (legal); typical N*T is small
    tr = min_rows
    # Grow row tile while the full-S stripe stays under the byte target and at
    # least two row tiles remain for v7x megacore balance.
    while (R % (tr * 2) == 0 and R // (tr * 2) >= 2
           and tr * 2 * S * itemsize <= target_bytes):
        tr *= 2
    return tr


def _plan_spatial(S, TR, itemsize, target_bytes):
    """Returns (TS, CW, n_chunks); TS <= S and a multiple of CW when tiled."""
    if S <= _CHUNK:
        return S, S, 1
    lanes_target = (target_bytes // max(1, TR * itemsize)) // _CHUNK * _CHUNK
    lanes_target = max(_CHUNK, lanes_target)
    TS = min(lanes_target, (S // _CHUNK) * _CHUNK)
    return TS, _CHUNK, TS // _CHUNK


def _ta_pool(x_flat, *, target_tile_bytes):
    """x_flat: (R, S) -> (R, 2) f32 with [:, 0]=mean, [:, 1]=max over S."""
    R, S = x_flat.shape
    itemsize = x_flat.dtype.itemsize
    TR = _pick_row_tile(R, S, itemsize, target_tile_bytes)
    TS, CW, n_chunks = _plan_spatial(S, TR, itemsize, target_tile_bytes)
    num_r = pl.cdiv(R, TR)            # exact by construction
    num_s = pl.cdiv(S, TS)
    need_mask = (S % TS) != 0

    kernel = functools.partial(_ta_pool_kernel, S=S, TS=TS, CW=CW,
                               n_chunks=n_chunks, need_mask=need_mask)

    cost = pl.CostEstimate(
        flops=2 * R * S,              # one add + one max/compare per element
        transcendentals=0,
        bytes_accessed=R * S * itemsize + R * 2 * 4,
    )

    return pl.pallas_call(
        kernel,
        out_shape=jax.ShapeDtypeStruct((R, 2), jnp.float32),
        grid_spec=pltpu.PrefetchScalarGridSpec(
            num_scalar_prefetch=0,
            grid=(num_r, num_s),
            in_specs=[pl.BlockSpec((TR, TS), lambda r, s: (r, s))],
            out_specs=pl.BlockSpec((TR, 2), lambda r, s: (r, 0)),
            scratch_shapes=[
                pltpu.VMEM((TR, CW), jnp.float32),   # lane-wide running sum
                pltpu.VMEM((TR, CW), jnp.float32),   # lane-wide running max
            ],
        ),
        compiler_params=pltpu.CompilerParams(
            dimension_semantics=("parallel", "arbitrary"),
            vmem_limit_bytes=32 * 1024 * 1024),
        cost_estimate=cost,
    )(x_flat)


def ta_forward(x, w1, w2, *, target_tile_bytes=6 * 1024 * 1024):
    """x: (N, T, D, H, W); w1: (T//r, T); w2: (T, T//r) -> (N, T, 1, 1, 1)."""
    N, T, D, H, W = x.shape
    S = D * H * W
    pooled = _ta_pool(x.reshape(N * T, S), target_tile_bytes=target_tile_bytes)
    avg = pooled[:, 0].reshape(N, T)
    mx = pooled[:, 1].reshape(N, T)

    # Shared MLP (1x1x1 convs, no bias) hoisted to plain XLA on the tiny pooled
    # vectors, per perf review; computed in f32, cast back to x.dtype.
    w1f = w1.astype(jnp.float32)
    w2f = w2.astype(jnp.float32)

    def mlp(v):                                   # v: (N, T)
        h = jnp.maximum(v @ w1f.T, 0.0)           # (N, T//r)
        return h @ w2f.T                          # (N, T)

    out = (mlp(avg) + mlp(mx)).astype(x.dtype)
    return out.reshape(N, T, 1, 1, 1)


def ta_reference(x, w1, w2):
    # Pure-JAX reference mirroring the PyTorch forward (sigmoid not applied).
    xf = x.astype(jnp.float32)
    avg = jnp.mean(xf, axis=(2, 3, 4))            # (N, T)
    mx = jnp.max(xf, axis=(2, 3, 4))              # (N, T)

    def mlp(v):
        h = jnp.maximum(v @ w1.T.astype(jnp.float32), 0.0)
        return h @ w2.T.astype(jnp.float32)

    out = (mlp(avg) + mlp(mx)).astype(x.dtype)
    return out.reshape(*out.shape, 1, 1, 1)


if __name__ == "__main__":
    key = jax.random.PRNGKey(0)
    kx1, kx2, kx3, kx4, kw1, kw2, kw3, kw4 = jax.random.split(key, 8)

    N, T, ratio = 2, 8, 2
    Tr = T // ratio
    # Conv3d weights (kernel size 1, no bias): (out_c, in_c, 1, 1, 1) -> 2D.
    w1 = 0.1 * jax.random.normal(kw1, (Tr, T), dtype=jnp.float32)
    w2 = 0.1 * jax.random.normal(kw2, (T, Tr), dtype=jnp.float32)

    # Case 1: f32, S=256 (< chunk width) -> single spatial tile, single chunk.
    x1 = jax.random.normal(kx1, (N, T, 4, 8, 8), dtype=jnp.float32)
    o1 = jax.block_until_ready(ta_forward(x1, w1, w2))
    r1 = ta_reference(x1, w1, w2)
    assert o1.shape == (N, T, 1, 1, 1), o1.shape
    assert jnp.allclose(o1, r1, atol=1e-5, rtol=1e-5), (
        float(jnp.max(jnp.abs(o1 - r1))))

    # Case 2: f32, S=2176 -> TS=2048 (4 fused chunks), 2 spatial tiles,
    # masked tail gated to the last tile (128 valid lanes).
    x2 = jax.random.normal(kx2, (N, T, 8, 16, 17), dtype=jnp.float32)
    o2 = jax.block_until_ready(ta_forward(x2, w1, w2))
    r2 = ta_reference(x2, w1, w2)
    assert jnp.allclose(o2, r2, atol=1e-5, rtol=1e-5), (
        float(jnp.max(jnp.abs(o2 - r2))))

    # Case 3: bf16 input -> 16-row sublane packing, f32 in-kernel accumulation.
    x3 = jax.random.normal(kx3, (N, T, 8, 16, 17), dtype=jnp.bfloat16)
    o3 = jax.block_until_ready(ta_forward(x3, w1, w2))
    r3 = ta_reference(x3, w1, w2)
    d3 = jnp.max(jnp.abs(o3.astype(jnp.float32) - r3.astype(jnp.float32)))
    assert jnp.allclose(o3.astype(jnp.float32), r3.astype(jnp.float32),
                        atol=2e-2, rtol=2e-2), float(d3)

    # Case 4: N*T not a multiple of the sublane packing -> full-row block fallback.
    T4, Tr4 = 6, 3
    w1b = 0.1 * jax.random.normal(kw3, (Tr4, T4), dtype=jnp.float32)
    w2b = 0.1 * jax.random.normal(kw4, (T4, Tr4), dtype=jnp.float32)
    x4 = jax.random.normal(kx4, (1, T4, 3, 4, 5), dtype=jnp.float32)   # R=6, S=60
    o4 = jax.block_until_ready(ta_forward(x4, w1b, w2b))
    r4 = ta_reference(x4, w1b, w2b)
    assert jnp.allclose(o4, r4, atol=1e-5, rtol=1e-5), (
        float(jnp.max(jnp.abs(o4 - r4))))

    print("KERNEL_OK")
</pallas_src>

<mosaic_0001>
module attributes {stable_mosaic.version = 11 : i64} {
  func.func @_ta_pool_kernel(%arg0: i32, %arg1: i32, %arg2: memref<8x256xf32, #tpu.memory_space<vmem>>, %arg3: memref<8x2xf32, #tpu.memory_space<vmem>>, %arg4: memref<8x256xf32, #tpu.memory_space<vmem>>, %arg5: memref<8x256xf32, #tpu.memory_space<vmem>>) attributes {dimension_semantics = [#tpu.dimension_semantics<parallel>, #tpu.dimension_semantics<arbitrary>], iteration_bounds = array<i64: 2, 1>, scalar_prefetch = 0 : i64, scratch_operands = 2 : i64, tpu.core_type = #tpu.core_type<tc>, window_params = [{transform_indices = @transform_0, window_bounds = array<i64: 8, 256>}, {transform_indices = @transform_1, window_bounds = array<i64: 8, 2>}]} {
    %c0_i32 = arith.constant 0 : i32
    %0 = arith.cmpi eq, %arg1, %c0_i32 : i32
    %1 = arith.extui %0 : i1 to i32
    %c0_i32_0 = arith.constant 0 : i32
    %2 = arith.cmpi ne, %1, %c0_i32_0 : i32
    scf.if %2 {
      %cst = arith.constant 0.000000e+00 : f32
      %13 = vector.broadcast %cst : f32 to vector<8x256xf32>
      %c0_12 = arith.constant 0 : index
      %c0_13 = arith.constant 0 : index
      %14 = vector.load %arg4[%c0_12, %c0_13] : memref<8x256xf32, #tpu.memory_space<vmem>>, vector<8x256xf32>
      tpu.vector_store %arg4[%c0_12, %c0_13], %13 {strides = array<i32>} : memref<8x256xf32, #tpu.memory_space<vmem>>, vector<8x256xf32>,
      %cst_14 = arith.constant 0xFF800000 : f32
      %15 = vector.broadcast %cst_14 : f32 to vector<8x256xf32>
      %c0_15 = arith.constant 0 : index
      %c0_16 = arith.constant 0 : index
      %16 = vector.load %arg5[%c0_15, %c0_16] : memref<8x256xf32, #tpu.memory_space<vmem>>, vector<8x256xf32>
      tpu.vector_store %arg5[%c0_15, %c0_16], %15 {strides = array<i32>} : memref<8x256xf32, #tpu.memory_space<vmem>>, vector<8x256xf32>,
    } else {
    }
    %c0 = arith.constant 0 : index
    %c0_1 = arith.constant 0 : index
    %3 = vector.load %arg4[%c0, %c0_1] : memref<8x256xf32, #tpu.memory_space<vmem>>, vector<8x256xf32>
    %c0_2 = arith.constant 0 : index
    %c0_3 = arith.constant 0 : index
    %4 = vector.load %arg5[%c0_2, %c0_3] : memref<8x256xf32, #tpu.memory_space<vmem>>, vector<8x256xf32>
    %c0_4 = arith.constant 0 : index
    %c0_5 = arith.constant 0 : index
    %5 = vector.load %arg2[%c0_4, %c0_5] : memref<8x256xf32, #tpu.memory_space<vmem>>, vector<8x256xf32>
    %6 = arith.addf %3, %5 : vector<8x256xf32>
    %7 = arith.maximumf %4, %5 : vector<8x256xf32>
    %c0_6 = arith.constant 0 : index
    %c0_7 = arith.constant 0 : index
    %8 = vector.load %arg4[%c0_6, %c0_7] : memref<8x256xf32, #tpu.memory_space<vmem>>, vector<8x256xf32>
    tpu.vector_store %arg4[%c0_6, %c0_7], %6 {strides = array<i32>} : memref<8x256xf32, #tpu.memory_space<vmem>>, vector<8x256xf32>,
    %c0_8 = arith.constant 0 : index
    %c0_9 = arith.constant 0 : index
    %9 = vector.load %arg5[%c0_8, %c0_9] : memref<8x256xf32, #tpu.memory_space<vmem>>, vector<8x256xf32>
    tpu.vector_store %arg5[%c0_8, %c0_9], %7 {strides = array<i32>} : memref<8x256xf32, #tpu.memory_space<vmem>>, vector<8x256xf32>,
    %c0_i32_10 = arith.constant 0 : i32
    %10 = arith.cmpi eq, %arg1, %c0_i32_10 : i32
    %11 = arith.extui %10 : i1 to i32
    %c0_i32_11 = arith.constant 0 : i32
    %12 = arith.cmpi ne, %11, %c0_i32_11 : i32
    scf.if %12 {
      %c0_12 = arith.constant 0 : index
      %c0_13 = arith.constant 0 : index
      %13 = vector.load %arg4[%c0_12, %c0_13] : memref<8x256xf32, #tpu.memory_space<vmem>>, vector<8x256xf32>
      %cst = arith.constant dense<0.000000e+00> : vector<8xf32>
      %14 = vector.multi_reduction <add>, %13, %cst [1] : vector<8x256xf32> to vector<8xf32>
      %15 = vector.shape_cast %14 : vector<8xf32> to vector<8x1xf32>
      %cst_14 = arith.constant 3.906250e-03 : f32
      %16 = vector.broadcast %cst_14 : f32 to vector<8x1xf32>
      %17 = arith.mulf %15, %16 : vector<8x1xf32>
      %c0_15 = arith.constant 0 : index
      %c0_16 = arith.constant 0 : index
      %18 = vector.load %arg5[%c0_15, %c0_16] : memref<8x256xf32, #tpu.memory_space<vmem>>, vector<8x256xf32>
      %cst_17 = arith.constant dense<0xFF800000> : vector<8xf32>
      %19 = vector.multi_reduction <maximumf>, %18, %cst_17 [1] : vector<8x256xf32> to vector<8xf32>
      %20 = vector.shape_cast %19 : vector<8xf32> to vector<8x1xf32>
      %21 = tpu.concatenate %17, %20 in 1 : vector<8x1xf32>, vector<8x1xf32> -> vector<8x2xf32>
      %c0_18 = arith.constant 0 : index
      %c0_19 = arith.constant 0 : index
      %22 = vector.load %arg3[%c0_18, %c0_19] : memref<8x2xf32, #tpu.memory_space<vmem>>, vector<8x2xf32>
      tpu.vector_store %arg3[%c0_18, %c0_19], %21 {strides = array<i32>} : memref<8x2xf32, #tpu.memory_space<vmem>>, vector<8x2xf32>,
    } else {
    }
    return
  }
  func.func @transform_0(%arg0: i32, %arg1: i32) -> (i32, i32) {
    %c0_i32 = arith.constant 0 : i32
    return %arg0, %arg1 : i32, i32
  }
  func.func @transform_1(%arg0: i32, %arg1: i32) -> (i32, i32) {
    %c0_i32 = arith.constant 0 : i32
    %c0_i32_0 = arith.constant 0 : i32
    return %arg0, %c0_i32 : i32, i32
  }
}

</mosaic_0001>

<bundles_post_ra>
// kernel: tpu_custom_call.1
= control target key start
LH: loop header
LB: loop body
LE: loop exit
PB: predicated region body
PF: predicated region fallthrough
CT: control target
= control target key end

     0   :  { %6 = vsyncpa [#allocation5], 0  ;;  %s552_s0 = inlined_call_operand.hbm [shape: f32[16,256], index: 0, kind: input, shape index: {}]   ;;  %s553_s1 = inlined_call_operand.vmem [shape: f32[16,2], index: 1, kind: output, shape index: {}]  }
   0x1   :  { %8 = vsyncpa [#allocation5 + $0x1], 0  ;;  %s427_s6 = smov 0   ;;  %s429_s7 = smov 0  }
   0x2   :  { %s431_s8 = smov 0   ;;  %s433_s9 = smov 0  }
   0x3   :  { %s435_s10 = smov 0   ;;  %s437_s11 = smov 0  }
   0x4 LB: > { %s266_s12 = sadd.s32 4294967295, %s414_s11   ;;  %s26_s13 = sadd.s32 1, %s410_s10  ;;  %s414_s11 = sphi %s437_s11, %s14_s11   ;;  %s410_s10 = sphi %s435_s10, %s563_s10   ;;  %s406_s9 = sphi %s433_s9, %s562_s9   ;;  %s402_s8 = sphi %s431_s8, %s561_s8   ;;  %s398_s7 = sphi %s429_s7, %s560_s7   ;;  %s394_s6 = sphi %s427_s6, %s559_s6  }
   0x5   : > { %p28_p0 = scmp.ge.s32.totalorder %s26_s13, 2  ;;  %s35_s14 = sadd.s32 1, %s402_s8 }
   0x6   : > { %p42_p1 = scmp.ne.s32.totalorder %s402_s8, %s398_s7  ;;  %p43_p2 = scmp.eq.s32.totalorder %s414_s11, 0 }
   0x7   : > { %s565_s13 = smov (%p28_p0, %s26_s13), 0  ;;  %p48_p4 = scmp.ne.s32.totalorder %s398_s7, %s394_s6 }
   0x8   : > { %p463_p3 = por %p43_p2, %p42_p1  ;;  %s30_s16 = ssub.s32 %s410_s10, %s565_s13 }
   0x9   : > { %p49_p5 = scmp.eq.s32.totalorder %s266_s12, 0  ;;  %p33_p6 = scmp.eq.s32.totalorder %s30_s16, 0 }
   0xa   : > { %p285_p8 = scmp.lt.s32.totalorder %s414_s11, 2  ;;  %s98_s19 = sand.u32 1, %s402_s8  }
   0xb   : > { %p470_p7 = por %p49_p5, %p48_p4  ;;  %s278_s20 = sshll.u32 %s410_s10, 8 }
   0xc   : > { %s476_s18 = scalar_select %p33_p6, %s402_s8, %s35_s14  }
   0xd   : > { %s270_s21 = sshll.u32 %s98_s19, 4  ;;  %s483_s24 = scalar_lea.hbm %s552_s0, %s278_s20 }
   0xe   : > { %s102_s25 = scalar_lea.vmem [#allocation4], %s270_s21  ;;  %p487_p9 = pnand %p285_p8, %p463_p3 }
   0xf   : > { %s112_s26 = sshll.u32 %s102_s25, 4  ;;  %s99_s28 = scalar_lea.sflag [#allocation5], %s98_s19  ;;  %s491_s26 = int_to_ptr.vmem [resolvable:$true] %s112_s26 }
  0x10   : > { %s334_s29 = scalar_lea.hbm %s483_s24, 256  ;;  %p336_p13 = pneg %p487_p9 }
  0x11   : > { %p335_p12 = scmp.ne.s32.totalorder %s483_s24, %s334_s29  ;;  %s339_s3 = scalar_lea.hbm %s552_s0, 512 }
  0x12   : > { %p340_p2 = scmp.lt.u32.totalorder %s483_s24, %s552_s0  ;;  %p341_p3 = scmp.lt.u32.totalorder %s339_s3, %s334_s29 }
  0x13   : > { %p337_p0 = pnand %p336_p13, %p335_p12  ;;  %p343_p5 = scmp.lt.u32.totalorder %s334_s29, %s483_s24 }
  0x14   : > { %p342_p4 = por %p341_p3, %p340_p2 }
  0x15   : > { %p338_p1 = pneg %p337_p0 }
  0x16   : > { %p344_p6 = por %p343_p5, %p342_p4 }
  0x18   : > { %p345_p8 = pnand %p344_p6, %p338_p1 }
  0x1a   : > { %348 = shalt.err (!%p345_p8)
}
  0x1b   : > { %s349_s6 = scalar_lea.vmem %s491_s26, 256  ;;  %s416_s12 = smov [#allocation4]  }
  0x1c   : > { %p350_p12 = scmp.ne.s32.totalorder %s491_s26, %s349_s6  ;;  %s354_s14 = sshll.u32 %s416_s12, 4  ;;  %s355_s14 = int_to_ptr.vmem [resolvable:$false] %s354_s14 }
  0x1d   : > { %s356_s15 = scalar_lea.vmem %s355_s14, 512  ;;  %p357_p11 = scmp.lt.s32.totalorder %s491_s26, %s355_s14 }
  0x1e   : > { %p352_p0 = pnand %p350_p12, %p336_p13  ;;  %p358_p2 = scmp.lt.s32.totalorder %s356_s15, %s349_s6 }
  0x20   : > { %p353_p10 = pneg %p352_p0  ;;  %p359_p3 = por %p358_p2, %p357_p11 }
  0x22   : > { %p360_p4 = pnand %p359_p3, %p353_p10 }
  0x24   : > { %363 = shalt.err (!%p360_p4)
}
  0x25   : > { %284 = dma.hbm_to_vmem [thread:$0]  (!%p487_p9), %s483_s24, 256, %s491_s26, %s99_s28  }
  0x26   : > { %p557_p1 = scmp.lt.s32.totalorder %s414_s11, 3  ;;  %p558_p5 = scmp.ge.s32.totalorder %s414_s11, 1 }
  0x28   : > { %p118_p13 = pnand %p558_p5, %p557_p1 }
  0x29   : > { %s123_s16 = sand.u32 (!%p118_p13), 1, %s398_s7  }
  0x2a   : > { %121 = sbr.rel (%p118_p13) target bundleno = 201 (0xc9), region = 24  ;;  %s274_s19 = sshll.u32 (!%p118_p13), %s123_s16, 4 }
  0x2b   : > { %s124_s20 = scalar_lea.sflag (!%p118_p13), [#allocation5], %s123_s16  ;;  %s127_s21 = scalar_lea.vmem (!%p118_p13), [#allocation4], %s274_s19 }
  0x31   : > { %389 = dma.done.wait (%p470_p7), %s124_s20, 256  }
  0x32   : > { %391 = vsyncadd (%p470_p7), %s124_s20, 4294967040  ;;  %v162_v0 = vld [vmem:[%s127_s21] sm:$0xff]  ;;  %v163_v1 = vld [vmem:[%s127_s21 + $0x8] sm:$0xff]  ;;  %p146_p9 = scmp.lt.s32.totalorder %s406_s9, 1  ;;  %vm186_vm0 = vcmask 7168   ;;  %vm188_vm1 = vcmask 15360  }
  0x33   : > { %v177_v2 = vadd.f32 %v163_v1, %v162_v0  ;;  %v183_v3 = vmax.f32 %v162_v0, %v163_v1 }
  0x34   : > { %s567_s9 = smov (!%p146_p9, %s406_s9), 1 }
  0x35   : > { %178 = vadd.xlane.f32.xlu0 %v177_v2  ;;  %s275_s22 = sshll.u32 %s567_s9, 3 }
  0x36   : > { %s149_s25 = scalar_lea.vmem %s553_s1, %s275_s22 }
  0x39   : > { %184 = vmax.xlane.f32.xlu0 %v183_v3 }
  0xc2   : > { %v179_v4 = vpop.xlane.xlu0 %178 }
  0xc3   : > { %v180_v5 = vmul.f32 0.00390625, %v179_v4 }
  0xc6   : > { %v185_v6 = vpop.xlane.xlu0 %184 }
  0xc7   : > { %v187_v7 = vsel %vm186_vm0, %v180_v5, %v185_v6 }
  0xc8   : > { %189 = vst.msk [vmem:[%s149_s25] sm:$0xff] %vm188_vm1, %v187_v7 }
  0xc9 PF: > { %s14_s11 = sadd.s32 1, %s414_s11   ;;  %s559_s6 = smov %s398_s7 }
  0xca   : > { %p11_p7 = scmp.ge.s32.totalorder %s14_s11, 4   ;;  %s560_s7 = smov %s402_s8 }
  0xcb   : > { %s561_s8 = smov %s476_s18  ;;  %s562_s9 = smov %s410_s10 }
  0xcc   : > { %s563_s10 = smov %s565_s13  ;;  %13 = sbr.rel (!%p11_p7) target bundleno = 4 (0x4), region = 72 }
  0xd3   :  { %209 = vsyncpa [#allocation5], 1 }
  0xd4   :  { %211 = vsyncpa [#allocation5 + $0x1], 1 }

</bundles_post_ra>
